<compile_context>
chip_gen: v5e
topology: v5e:2x2
jax: 0.10.0
libtpu: 0.0.40
codegen_flags: <defaults>
</compile_context>

<pallas_src>
import functools

import jax
import jax.numpy as jnp
from jax.experimental import pallas as pl
from jax.experimental.pallas import tpu as pltpu

_LANES = 128
_IN_FEATURES = 28 * 28      # 784
_NUM_CLASSES = 10
_CLASS_PAD = _LANES         # lane-dense padded class axis (10 -> 128)


def _round_up(n, m):
    return ((n + m - 1) // m) * m


def _pick_batch_tile(batch):
    """>= 4 grid steps when possible (pipelines both v7x TCs), tile <= 512."""
    tile = _round_up(max(1, pl.cdiv(batch, 4)), 8)
    return max(8, min(512, tile))


def _mlp_kernel(x_ref, w1_ref, b1_ref, w2_ref, b2_ref, w3_ref, b3_ref, o_ref):
    # Entire hot path (3 matmuls + relu + log_softmax) runs on-chip in VMEM.
    x = x_ref[...].astype(jnp.bfloat16)                         # cast on-chip

    h1 = jnp.dot(x, w1_ref[...], preferred_element_type=jnp.float32) + b1_ref[...]
    h1 = jnp.maximum(h1, 0.0)

    h2 = jnp.dot(h1.astype(w2_ref.dtype), w2_ref[...],
                 preferred_element_type=jnp.float32) + b2_ref[...]
    h2 = jnp.maximum(h2, 0.0)

    z = jnp.dot(h2.astype(w3_ref.dtype), w3_ref[...],
                preferred_element_type=jnp.float32) + b3_ref[...]

    # log_softmax along the (padded, 128-wide) class axis.  Padded classes
    # carry a -1e9 bias, so exp(z_pad - m) == 0 and they never contribute.
    m = jnp.max(z, axis=-1, keepdims=True)
    e = jnp.exp(z - m)
    lse = jnp.log(jnp.sum(e, axis=-1, keepdims=True)) + m
    o_ref[...] = (z - lse).astype(o_ref.dtype)


def prepare_params(w1, b1, w2, b2, w3, b3):
    """One-time parameter prep (call OUTSIDE the per-step forward).

    Weights (in, out) -> bf16; biases -> f32 (1, out); class axis padded
    10 -> 128 with zero weight columns and a -1e9 bias."""
    w1p = w1.astype(jnp.bfloat16)
    w2p = w2.astype(jnp.bfloat16)
    w3p = jnp.pad(w3, ((0, 0), (0, _CLASS_PAD - _NUM_CLASSES))).astype(jnp.bfloat16)
    b1p = b1.reshape(1, -1).astype(jnp.float32)
    b2p = b2.reshape(1, -1).astype(jnp.float32)
    b3p = jnp.pad(b3.reshape(1, -1).astype(jnp.float32),
                  ((0, 0), (0, _CLASS_PAD - _NUM_CLASSES)),
                  constant_values=-1e9)
    return w1p, b1p, w2p, b2p, w3p, b3p


@functools.partial(jax.jit, static_argnames=("batch_tile",))
def mnist_mlp_forward(x, w1p, b1p, w2p, b2p, w3p, b3p, *, batch_tile=None):
    """x: (B, 1, 28, 28) float32 NCHW.  Params from prepare_params().

    Returns (B, 10) float32 log-probabilities."""
    B = x.shape[0]
    H = w1p.shape[1]
    if batch_tile is None:
        batch_tile = _pick_batch_tile(B)

    # x.view(-1, 784): layout-preserving reshape, no HBM copy, streamed as f32.
    x2d = x.reshape(B, _IN_FEATURES)

    grid = (pl.cdiv(B, batch_tile),)

    # Weights/biases are tiny and fully VMEM-resident (constant block index);
    # only the batch dimension of activations/outputs is tiled over the grid.
    full = lambda shape: pl.BlockSpec(shape, lambda i: (0, 0))

    weight_elems = _IN_FEATURES * H + H * H + H * _CLASS_PAD
    cost = pl.CostEstimate(
        flops=2 * B * weight_elems,
        transcendentals=B * (_CLASS_PAD + 1),                  # exp + log
        bytes_accessed=(B * _IN_FEATURES * 4                   # x (f32 in)
                        + weight_elems * 2                     # bf16 weights
                        + (2 * H + _CLASS_PAD) * 4             # f32 biases
                        + B * _CLASS_PAD * 4),                 # f32 out slab
    )

    out = pl.pallas_call(
        _mlp_kernel,
        out_shape=jax.ShapeDtypeStruct((B, _CLASS_PAD), jnp.float32),
        grid_spec=pltpu.PrefetchScalarGridSpec(
            num_scalar_prefetch=0,
            grid=grid,
            in_specs=[
                pl.BlockSpec((batch_tile, _IN_FEATURES), lambda i: (i, 0)),  # x
                full((_IN_FEATURES, H)),   # W1
                full((1, H)),              # b1
                full((H, H)),              # W2
                full((1, H)),              # b2
                full((H, _CLASS_PAD)),     # W3 (class-padded)
                full((1, _CLASS_PAD)),     # b3 (class-padded with -1e9)
            ],
            out_specs=pl.BlockSpec((batch_tile, _CLASS_PAD), lambda i: (i, 0)),
        ),
        compiler_params=pltpu.CompilerParams(
            dimension_semantics=("parallel",),
        ),
        cost_estimate=cost,
    )(x2d, w1p, b1p, w2p, b2p, w3p, b3p)

    # Only the class-axis slice remains; no batch pad rows to strip.
    return out[:, :_NUM_CLASSES]


def _reference(x, w1, b1, w2, b2, w3, b3, *, matmul_dtype=jnp.float32):
    xb = x.reshape(x.shape[0], -1).astype(matmul_dtype)
    h1 = jnp.maximum(
        jnp.dot(xb, w1.astype(matmul_dtype), preferred_element_type=jnp.float32) + b1, 0.0)
    h2 = jnp.maximum(
        jnp.dot(h1.astype(matmul_dtype), w2.astype(matmul_dtype),
                preferred_element_type=jnp.float32) + b2, 0.0)
    z = jnp.dot(h2.astype(matmul_dtype), w3.astype(matmul_dtype),
                preferred_element_type=jnp.float32) + b3
    return jax.nn.log_softmax(z, axis=1)


if __name__ == "__main__":
    # Small shapes; batch deliberately NOT a tile multiple (exercises the
    # clipped final block) and large enough for a 4-step grid.
    B, H, C = 200, 128, 10

    key = jax.random.PRNGKey(0)
    kx, k1, k2, k3, k4, k5, k6 = jax.random.split(key, 7)

    x = jax.random.normal(kx, (B, 1, 28, 28), dtype=jnp.float32)

    # Deterministic parameter init (scaled normal), weights stored as (in, out).
    w1 = jax.random.normal(k1, (28 * 28, H), dtype=jnp.float32) * 0.02
    b1 = jax.random.normal(k2, (1, H), dtype=jnp.float32) * 0.01
    w2 = jax.random.normal(k3, (H, H), dtype=jnp.float32) * 0.05
    b2 = jax.random.normal(k4, (1, H), dtype=jnp.float32) * 0.01
    w3 = jax.random.normal(k5, (H, C), dtype=jnp.float32) * 0.05
    b3 = jax.random.normal(k6, (1, C), dtype=jnp.float32) * 0.01

    # One-time weight prep outside the jitted forward (per-call cost removed).
    params = prepare_params(w1, b1, w2, b2, w3, b3)
    params = jax.block_until_ready(params)

    out = mnist_mlp_forward(x, *params)
    out = jax.block_until_ready(out)
    assert out.shape == (B, C)

    # Apples-to-apples reference (same bf16 matmul inputs / f32 accumulation).
    ref_bf16 = _reference(x, w1, b1, w2, b2, w3, b3, matmul_dtype=jnp.bfloat16)
    assert jnp.allclose(out, ref_bf16, atol=5e-3, rtol=5e-3), "mismatch vs bf16 reference"

    # Loose sanity check against the full-f32 reference (bf16 rounding only).
    ref_f32 = _reference(x, w1, b1, w2, b2, w3, b3, matmul_dtype=jnp.float32)
    assert jnp.allclose(out, ref_f32, atol=1e-1, rtol=1e-1), "mismatch vs f32 reference"

    print("KERNEL_OK")
</pallas_src>

<mosaic_0001>
module attributes {stable_mosaic.version = 11 : i64} {
  func.func @_mlp_kernel(%arg0: i32, %arg1: memref<56x784xf32, #tpu.memory_space<vmem>>, %arg2: memref<784x128xbf16, #tpu.memory_space<vmem>>, %arg3: memref<1x128xf32, #tpu.memory_space<vmem>>, %arg4: memref<128x128xbf16, #tpu.memory_space<vmem>>, %arg5: memref<1x128xf32, #tpu.memory_space<vmem>>, %arg6: memref<128x128xbf16, #tpu.memory_space<vmem>>, %arg7: memref<1x128xf32, #tpu.memory_space<vmem>>, %arg8: memref<56x128xf32, #tpu.memory_space<vmem>>) attributes {dimension_semantics = [#tpu.dimension_semantics<parallel>], iteration_bounds = array<i64: 4>, scalar_prefetch = 0 : i64, scratch_operands = 0 : i64, tpu.core_type = #tpu.core_type<tc>, window_params = [{transform_indices = @transform_0, window_bounds = array<i64: 56, 784>}, {pipeline_mode = #tpu.pipeline_mode<synchronous>, transform_indices = @transform_1, window_bounds = array<i64: 784, 128>}, {pipeline_mode = #tpu.pipeline_mode<synchronous>, transform_indices = @transform_2, window_bounds = array<i64: 1, 128>}, {pipeline_mode = #tpu.pipeline_mode<synchronous>, transform_indices = @transform_3, window_bounds = array<i64: 128, 128>}, {pipeline_mode = #tpu.pipeline_mode<synchronous>, transform_indices = @transform_4, window_bounds = array<i64: 1, 128>}, {pipeline_mode = #tpu.pipeline_mode<synchronous>, transform_indices = @transform_5, window_bounds = array<i64: 128, 128>}, {pipeline_mode = #tpu.pipeline_mode<synchronous>, transform_indices = @transform_6, window_bounds = array<i64: 1, 128>}, {transform_indices = @transform_7, window_bounds = array<i64: 56, 128>}]} {
    %c0 = arith.constant 0 : index
    %c0_0 = arith.constant 0 : index
    %0 = vector.load %arg1[%c0, %c0_0] : memref<56x784xf32, #tpu.memory_space<vmem>>, vector<56x784xf32>
    %1 = arith.truncf %0 : vector<56x784xf32> to vector<56x784xbf16>
    %c0_1 = arith.constant 0 : index
    %c0_2 = arith.constant 0 : index
    %2 = vector.load %arg2[%c0_1, %c0_2] : memref<784x128xbf16, #tpu.memory_space<vmem>>, vector<784x128xbf16>
    %cst = arith.constant dense<0.000000e+00> : vector<56x128xf32>
    %3 = tpu.matmul %1, %2, %cst {dimension_numbers = #tpu.dot_dimension_numbers<[1], [0], [0], [1], [0, 0, 1, 1], [], []>} : vector<56x784xbf16>, vector<784x128xbf16>, vector<56x128xf32> -> vector<56x128xf32>
    %c0_3 = arith.constant 0 : index
    %c0_4 = arith.constant 0 : index
    %4 = vector.load %arg3[%c0_3, %c0_4] : memref<1x128xf32, #tpu.memory_space<vmem>>, vector<1x128xf32>
    %5 = vector.broadcast %4 : vector<1x128xf32> to vector<56x128xf32>
    %6 = arith.addf %3, %5 : vector<56x128xf32>
    %cst_5 = arith.constant 0.000000e+00 : f32
    %7 = vector.broadcast %cst_5 : f32 to vector<56x128xf32>
    %8 = arith.maximumf %6, %7 : vector<56x128xf32>
    %9 = arith.truncf %8 : vector<56x128xf32> to vector<56x128xbf16>
    %c0_6 = arith.constant 0 : index
    %c0_7 = arith.constant 0 : index
    %10 = vector.load %arg4[%c0_6, %c0_7] : memref<128x128xbf16, #tpu.memory_space<vmem>>, vector<128x128xbf16>
    %cst_8 = arith.constant dense<0.000000e+00> : vector<56x128xf32>
    %11 = tpu.matmul %9, %10, %cst_8 {dimension_numbers = #tpu.dot_dimension_numbers<[1], [0], [0], [1], [0, 0, 1, 1], [], []>} : vector<56x128xbf16>, vector<128x128xbf16>, vector<56x128xf32> -> vector<56x128xf32>
    %c0_9 = arith.constant 0 : index
    %c0_10 = arith.constant 0 : index
    %12 = vector.load %arg5[%c0_9, %c0_10] : memref<1x128xf32, #tpu.memory_space<vmem>>, vector<1x128xf32>
    %13 = vector.broadcast %12 : vector<1x128xf32> to vector<56x128xf32>
    %14 = arith.addf %11, %13 : vector<56x128xf32>
    %cst_11 = arith.constant 0.000000e+00 : f32
    %15 = vector.broadcast %cst_11 : f32 to vector<56x128xf32>
    %16 = arith.maximumf %14, %15 : vector<56x128xf32>
    %17 = arith.truncf %16 : vector<56x128xf32> to vector<56x128xbf16>
    %c0_12 = arith.constant 0 : index
    %c0_13 = arith.constant 0 : index
    %18 = vector.load %arg6[%c0_12, %c0_13] : memref<128x128xbf16, #tpu.memory_space<vmem>>, vector<128x128xbf16>
    %cst_14 = arith.constant dense<0.000000e+00> : vector<56x128xf32>
    %19 = tpu.matmul %17, %18, %cst_14 {dimension_numbers = #tpu.dot_dimension_numbers<[1], [0], [0], [1], [0, 0, 1, 1], [], []>} : vector<56x128xbf16>, vector<128x128xbf16>, vector<56x128xf32> -> vector<56x128xf32>
    %c0_15 = arith.constant 0 : index
    %c0_16 = arith.constant 0 : index
    %20 = vector.load %arg7[%c0_15, %c0_16] : memref<1x128xf32, #tpu.memory_space<vmem>>, vector<1x128xf32>
    %21 = vector.broadcast %20 : vector<1x128xf32> to vector<56x128xf32>
    %22 = arith.addf %19, %21 : vector<56x128xf32>
    %cst_17 = arith.constant dense<0xFF800000> : vector<56xf32>
    %23 = vector.multi_reduction <maximumf>, %22, %cst_17 [1] : vector<56x128xf32> to vector<56xf32>
    %24 = vector.shape_cast %23 : vector<56xf32> to vector<56x1xf32>
    %25 = vector.broadcast %24 : vector<56x1xf32> to vector<56x128xf32>
    %26 = arith.subf %22, %25 : vector<56x128xf32>
    %27 = math.exp %26 : vector<56x128xf32>
    %cst_18 = arith.constant dense<0.000000e+00> : vector<56xf32>
    %28 = vector.multi_reduction <add>, %27, %cst_18 [1] : vector<56x128xf32> to vector<56xf32>
    %29 = vector.shape_cast %28 : vector<56xf32> to vector<56x1xf32>
    %30 = math.log %29 : vector<56x1xf32>
    %31 = arith.addf %30, %24 : vector<56x1xf32>
    %32 = vector.broadcast %31 : vector<56x1xf32> to vector<56x128xf32>
    %33 = arith.subf %22, %32 : vector<56x128xf32>
    %c0_19 = arith.constant 0 : index
    %c0_20 = arith.constant 0 : index
    %34 = vector.load %arg8[%c0_19, %c0_20] : memref<56x128xf32, #tpu.memory_space<vmem>>, vector<56x128xf32>
    tpu.vector_store %arg8[%c0_19, %c0_20], %33 {strides = array<i32>} : memref<56x128xf32, #tpu.memory_space<vmem>>, vector<56x128xf32>,
    return
  }
  func.func @transform_0(%arg0: i32) -> (i32, i32) {
    %c0_i32 = arith.constant 0 : i32
    %c0_i32_0 = arith.constant 0 : i32
    return %arg0, %c0_i32 : i32, i32
  }
  func.func @transform_1(%arg0: i32) -> (i32, i32) {
    %c0_i32 = arith.constant 0 : i32
    %c0_i32_0 = arith.constant 0 : i32
    %c0_i32_1 = arith.constant 0 : i32
    return %c0_i32, %c0_i32_0 : i32, i32
  }
  func.func @transform_2(%arg0: i32) -> (i32, i32) {
    %c0_i32 = arith.constant 0 : i32
    %c0_i32_0 = arith.constant 0 : i32
    %c0_i32_1 = arith.constant 0 : i32
    return %c0_i32, %c0_i32_0 : i32, i32
  }
  func.func @transform_3(%arg0: i32) -> (i32, i32) {
    %c0_i32 = arith.constant 0 : i32
    %c0_i32_0 = arith.constant 0 : i32
    %c0_i32_1 = arith.constant 0 : i32
    return %c0_i32, %c0_i32_0 : i32, i32
  }
  func.func @transform_4(%arg0: i32) -> (i32, i32) {
    %c0_i32 = arith.constant 0 : i32
    %c0_i32_0 = arith.constant 0 : i32
    %c0_i32_1 = arith.constant 0 : i32
    return %c0_i32, %c0_i32_0 : i32, i32
  }
  func.func @transform_5(%arg0: i32) -> (i32, i32) {
    %c0_i32 = arith.constant 0 : i32
    %c0_i32_0 = arith.constant 0 : i32
    %c0_i32_1 = arith.constant 0 : i32
    return %c0_i32, %c0_i32_0 : i32, i32
  }
  func.func @transform_6(%arg0: i32) -> (i32, i32) {
    %c0_i32 = arith.constant 0 : i32
    %c0_i32_0 = arith.constant 0 : i32
    %c0_i32_1 = arith.constant 0 : i32
    return %c0_i32, %c0_i32_0 : i32, i32
  }
  func.func @transform_7(%arg0: i32) -> (i32, i32) {
    %c0_i32 = arith.constant 0 : i32
    %c0_i32_0 = arith.constant 0 : i32
    return %arg0, %c0_i32 : i32, i32
  }
}

</mosaic_0001>

<bundles_post_ra>
// kernel: mnist_mlp_forward.1
= control target key start
LH: loop header
LB: loop body
LE: loop exit
PB: predicated region body
PF: predicated region fallthrough
CT: control target
= control target key end

     0   :  { %s2150_s24 = smov 0   ;;  %s2152_s25 = smov 0   ;;  %s2557_s0 = inlined_call_operand.vmem [shape: f32[200,784], index: 0, kind: input, shape index: {}]   ;;  %s2558_s1 = inlined_call_operand.vmem [shape: bf16[784,128], index: 1, kind: input, shape index: {}]   ;;  %s2559_s2 = inlined_call_operand.vmem [shape: f32[1,128], index: 2, kind: input, shape index: {}]   ;;  %s2560_s3 = inlined_call_operand.vmem [shape: bf16[128,128], index: 3, kind: input, shape index: {}]   ;;  %s2561_s4 = inlined_call_operand.vmem [shape: f32[1,128], index: 4, kind: input, shape index: {}]   ;;  %s2562_s5 = inlined_call_operand.vmem [shape: bf16[128,128], index: 5, kind: input, shape index: {}]   ;;  %s2563_s6 = inlined_call_operand.vmem [shape: f32[1,128], index: 6, kind: input, shape index: {}]   ;;  %s2564_s7 = inlined_call_operand.vmem [shape: f32[200,128], index: 7, kind: output, shape index: {}]  }
   0x1   :  { %s2154_s26 = smov 0  }
   0x2 LB: > { %s2163_s27 = sadd.s32 4294967295, %s2076_s26   ;;  %s2165_s28 = sadd.s32 1, %s2076_s26   ;;  %s2076_s26 = sphi %s2154_s26, %s2571_s26   ;;  %s2072_s25 = sphi %s2152_s25, %s2570_s25   ;;  %s2068_s24 = sphi %s2150_s24, %s2569_s24  }
   0x3   : > { %s173_s29 = ssub.s32 %s2076_s26, %s2165_s28  ;;  %s176_s30 = sadd.s32 1, %s2072_s25 }
   0x4   : > { %p174_p0 = scmp.eq.s32.totalorder %s173_s29, 0  ;;  %p186_p1 = scmp.ne.s32.totalorder %s2072_s25, %s2068_s24 }
   0x5   : > { %p187_p2 = scmp.eq.s32.totalorder %s2163_s27, 3  ;;  %p1534_p3 = scmp.ge.s32.totalorder %s2076_s26, 1 }
   0x6   : > { %s2173_s8 = scalar_select %p174_p0, %s2072_s25, %s176_s30  }
   0x7   : > { %p2175_p4 = por %p187_p2, %p186_p1  ;;  %p249_p5 = scmp.lt.s32.totalorder %s2076_s26, 5 }
   0x9   : > { %p250_p6 = pnand %p1534_p3, %p249_p5 }
   0xa   : > { %s2201_s26 = smul.u32 (!%p250_p6), 7, %s2163_s27  ;;  %s283_s10 = sand.u32 (!%p250_p6), 1, %s2068_s24  }
   0xb   : > { %253 = sbr.rel (%p250_p6) target bundleno = 919 (0x397), region = 48 }
   0xc   : > { %p292_p7 = scmp.lt.s32.totalorder (!%p250_p6), %s2201_s26, 24 }
  0x10   : > { %v1819_v0 = vld [vmem:[%s2558_s1 + $0x38] sm:$0xff]  ;;  %v1818_v2 = vld [vmem:[%s2558_s1 + $0x30] sm:$0xff]  ;;  %v1817_v5 = vld [vmem:[%s2558_s1 + $0x28] sm:$0xff]  ;;  %s293_s20 = scalar_select %p292_p7, %s2201_s26, 24  ;;  %vm782_vm0 = vcmask 130048  }
  0x11   : > { %v1835_v1 = vld [vmem:[%s2558_s1 + $0xb8] sm:$0xff]  ;;  %1878 = vmatpush.bf16.msra.mxu1 %v1819_v0  ;;  %v1834_v3 = vld [vmem:[%s2558_s1 + $0xb0] sm:$0xff]  ;;  %795 = vmatpush.bf16.msra.mxu0 %v1819_v0  ;;  %v1833_v6 = vld [vmem:[%s2558_s1 + $0xa8] sm:$0xff]  ;;  %s1297_s24 = ssub.s32 (%p2175_p4), 25, %s2201_s26  ;;  %s1877_s13 = smul.u32 (%p2175_p4), 56, %s2163_s27 }
  0x12   : > { %851 = vmatpush.bf16.msra.mxu2 %v1835_v1  ;;  %v1843_v4 = vld [vmem:[%s2558_s1 + $0xf8] sm:$0xff]  ;;  %v1842_v7 = vld [vmem:[%s2558_s1 + $0xf0] sm:$0xff]  ;;  %v1816_v8 = vld [vmem:[%s2558_s1 + $0x20] sm:$0xff]  ;;  %s1895_s11 = smul.u32 56, %s293_s20  ;;  %p1298_p8 = scmp.lt.s32.totalorder (%p2175_p4), %s1297_s24, 7 }
  0x13   : > { %879 = vmatpush.bf16.msra.mxu3 %v1843_v4  ;;  %v1832_v9 = vld [vmem:[%s2558_s1 + $0xa0] sm:$0xff]  ;;  %v1841_v10 = vld [vmem:[%s2558_s1 + $0xe8] sm:$0xff]  ;;  %v1815_v11 = vld [vmem:[%s2558_s1 + $0x18] sm:$0xff]  ;;  %s2504_s16 = scalar_lea.vmem (%p2175_p4), %s2564_s7, %s1877_s13  }
  0x14   : > { %v1831_v12 = vld [vmem:[%s2558_s1 + $0x98] sm:$0xff]  ;;  %v1840_v13 = vld [vmem:[%s2558_s1 + $0xe0] sm:$0xff]  ;;  %v1814_v14 = vld [vmem:[%s2558_s1 + $0x10] sm:$0xff]  ;;  %s2244_s20 = scalar_lea.vmem %s2557_s0, %s1895_s11  ;;  %s1894_s11 = smul.u32 56, %s283_s10 }
  0x15   : > { %1879 = vmatpush.bf16.msra.mxu1 %v1818_v2  ;;  %796 = vmatpush.bf16.msra.mxu0 %v1818_v2  ;;  %v1830_v15 = vld [vmem:[%s2558_s1 + $0x90] sm:$0xff]  ;;  %v1839_v16 = vld [vmem:[%s2558_s1 + $0xd8] sm:$0xff]  ;;  %v1813_v17 = vld [vmem:[%s2558_s1 + $0x8] sm:$0xff] }
  0x16   : > { %852 = vmatpush.bf16.msra.mxu2 %v1834_v3  ;;  %v1829_v18 = vld [vmem:[%s2558_s1 + $0x88] sm:$0xff]  ;;  %v1838_v19 = vld [vmem:[%s2558_s1 + $0xd0] sm:$0xff]  ;;  %v1812_v20 = vld [vmem:[%s2558_s1] sm:$0xff]  ;;  %s2482_s12 = scalar_lea.vmem [#allocation2], %s1894_s11  }
  0x17   : > { %880 = vmatpush.bf16.msra.mxu3 %v1842_v7  ;;  %v337_v21 = vld [vmem:[%s2244_s20 + $0xe0] sm:$0xff]  ;;  %v344_v23 = vld [vmem:[%s2244_s20 + $0x118] sm:$0xff]  ;;  %v311_v24 = vld [vmem:[%s2244_s20 + $0x10] sm:$0xff] }
  0x18   : > { %v1828_v22 = vld [vmem:[%s2558_s1 + $0x80] sm:$0xff]  ;;  %v318_v25 = vld [vmem:[%s2244_s20 + $0x48] sm:$0xff]  ;;  %v1827_v26 = vld [vmem:[%s2558_s1 + $0x78] sm:$0xff]  ;;  %v372_v30 = vpack.c.bf16 %v344_v23, %v337_v21 }
  0x19   : > { %1880 = vmatpush.bf16.msra.mxu1 %v1817_v5  ;;  %797 = vmatpush.bf16.msra.mxu0 %v1817_v5  ;;  %v309_v27 = vld [vmem:[%s2244_s20] sm:$0xff]  ;;  %v316_v28 = vld [vmem:[%s2244_s20 + $0x38] sm:$0xff]  ;;  %v360_v31 = vpack.c.bf16 %v318_v25, %v311_v24  ;;  %v1837_v33 = vld [vmem:[%s2558_s1 + $0xc8] sm:$0xff] }
  0x1a   : > { %853 = vmatpush.bf16.msra.mxu2 %v1833_v6  ;;  %v1851_v29 = vld [vmem:[%s2558_s1 + $0x138] sm:$0xff]  ;;  %v358_v32 = vpack.c.bf16 %v316_v28, %v309_v27  ;;  %v1826_v34 = vld [vmem:[%s2558_s1 + $0x70] sm:$0xff]  ;;  %v1836_v36 = vld [vmem:[%s2558_s1 + $0xc0] sm:$0xff] }
  0x1b   : > { %881 = vmatpush.bf16.msra.mxu3 %v1841_v10  ;;  %v1850_v35 = vld [vmem:[%s2558_s1 + $0x130] sm:$0xff]  ;;  %v312_v37 = vld [vmem:[%s2244_s20 + $0x18] sm:$0xff]  ;;  %v1825_v39 = vld [vmem:[%s2558_s1 + $0x68] sm:$0xff] }
  0x1c   : > { %v319_v38 = vld [vmem:[%s2244_s20 + $0x50] sm:$0xff]  ;;  %v1849_v40 = vld [vmem:[%s2558_s1 + $0x128] sm:$0xff]  ;;  %v1824_v42 = vld [vmem:[%s2558_s1 + $0x60] sm:$0xff] }
  0x1d   : > { %1881 = vmatpush.bf16.msra.mxu1 %v1816_v8  ;;  %798 = vmatpush.bf16.msra.mxu0 %v1816_v8  ;;  %v361_v41 = vpack.c.bf16 %v319_v38, %v312_v37  ;;  %v1848_v43 = vld [vmem:[%s2558_s1 + $0x120] sm:$0xff]  ;;  %v351_v44 = vld [vmem:[%s2244_s20 + $0x150] sm:$0xff]  ;;  %v332_v46 = vld [vmem:[%s2244_s20 + $0xb8] sm:$0xff] }
  0x1e   : > { %854 = vmatpush.bf16.msra.mxu2 %v1832_v9  ;;  %v325_v45 = vld [vmem:[%s2244_s20 + $0x80] sm:$0xff]  ;;  %v1823_v47 = vld [vmem:[%s2558_s1 + $0x58] sm:$0xff]  ;;  %v323_v48 = vld [vmem:[%s2244_s20 + $0x70] sm:$0xff]  ;;  %v379_v51 = vpack.c.bf16 %v351_v44, %v351_v44 }
  0x1f   : > { %882 = vmatpush.bf16.msra.mxu3 %v1840_v13  ;;  %v330_v49 = vld [vmem:[%s2244_s20 + $0xa8] sm:$0xff]  ;;  %v1847_v50 = vld [vmem:[%s2558_s1 + $0x118] sm:$0xff]  ;;  %v367_v52 = vpack.c.bf16 %v332_v46, %v325_v45  ;;  %v1822_v54 = vld [vmem:[%s2558_s1 + $0x50] sm:$0xff] }
  0x20   : > { %v365_v53 = vpack.c.bf16 %v330_v49, %v323_v48  ;;  %v1846_v55 = vld [vmem:[%s2558_s1 + $0x110] sm:$0xff]  ;;  %v326_v56 = vld [vmem:[%s2244_s20 + $0x88] sm:$0xff]  ;;  %v333_v57 = vld [vmem:[%s2244_s20 + $0xc0] sm:$0xff] }
  0x21   : > { %1882 = vmatpush.bf16.msra.mxu1 %v1815_v11  ;;  %799 = vmatpush.bf16.msra.mxu0 %v1815_v11  ;;  %v1821_v58 = vld [vmem:[%s2558_s1 + $0x48] sm:$0xff]  ;;  %v368_v60 = vpack.c.bf16 %v333_v57, %v326_v56  ;;  %v1820_v61 = vld [vmem:[%s2558_s1 + $0x40] sm:$0xff]  ;;  %v1859_v62 = vld [vmem:[%s2558_s1 + $0x178] sm:$0xff] }
  0x22   : > { %855 = vmatpush.bf16.msra.mxu2 %v1831_v12  ;;  %v1845_v59 = vld [vmem:[%s2558_s1 + $0x108] sm:$0xff]  ;;  %v1844_v63 = vld [vmem:[%s2558_s1 + $0x100] sm:$0xff]  ;;  %v339_v2 = vld [vmem:[%s2244_s20 + $0xf0] sm:$0xff] }
  0x23   : > { %883 = vmatpush.bf16.msra.mxu3 %v1839_v16  ;;  %v310_v0 = vld [vmem:[%s2244_s20 + $0x8] sm:$0xff]  ;;  %v317_v1 = vld [vmem:[%s2244_s20 + $0x40] sm:$0xff]  ;;  %v320_v5 = vld [vmem:[%s2244_s20 + $0x58] sm:$0xff] }
  0x24   : > { %v346_v3 = vld [vmem:[%s2244_s20 + $0x128] sm:$0xff]  ;;  %v313_v4 = vld [vmem:[%s2244_s20 + $0x20] sm:$0xff]  ;;  %v1858_v6 = vld [vmem:[%s2558_s1 + $0x170] sm:$0xff]  ;;  %v359_v7 = vpack.c.bf16 %v317_v1, %v310_v0 }
  0x25   : > { %1883 = vmatpush.bf16.msra.mxu1 %v1814_v14  ;;  %800 = vmatpush.bf16.msra.mxu0 %v1814_v14  ;;  %v374_v8 = vpack.c.bf16 %v346_v3, %v339_v2  ;;  %v362_v9 = vpack.c.bf16 %v320_v5, %v313_v4  ;;  %v1857_v10 = vld [vmem:[%s2558_s1 + $0x168] sm:$0xff]  ;;  %v340_v11 = vld [vmem:[%s2244_s20 + $0xf8] sm:$0xff]  ;;  %v347_v12 = vld [vmem:[%s2244_s20 + $0x130] sm:$0xff] }
  0x26   : > { %856 = vmatpush.bf16.msra.mxu2 %v1830_v15  ;;  %v1860_v13 = vld [vmem:[%s2558_s1 + $0x180] sm:$0xff]  ;;  %v375_v15 = vpack.c.bf16 %v347_v12, %v340_v11  ;;  %v1855_v16 = vld [vmem:[%s2558_s1 + $0x158] sm:$0xff]  ;;  %v334_v21 = vld [vmem:[%s2244_s20 + $0xc8] sm:$0xff] }
  0x27   : > { %884 = vmatpush.bf16.msra.mxu3 %v1838_v19  ;;  %v1856_v14 = vld [vmem:[%s2558_s1 + $0x160] sm:$0xff]  ;;  %v354_v27 = vld [vmem:[%s2244_s20 + $0x168] sm:$0xff]  ;;  %v352_v38 = vld [vmem:[%s2244_s20 + $0x158] sm:$0xff] }
  0x28   : > { %v353_v19 = vld [vmem:[%s2244_s20 + $0x160] sm:$0xff]  ;;  %v336_v46 = vld [vmem:[%s2244_s20 + $0xd8] sm:$0xff] }
  0x29   : > { %1884 = vmatpush.bf16.msra.mxu1 %v1813_v17  ;;  %801 = vmatpush.bf16.msra.mxu0 %v1813_v17  ;;  %v324_v17 = vld [vmem:[%s2244_s20 + $0x78] sm:$0xff]  ;;  %v381_v24 = vpack.c.bf16 %v353_v19, %v353_v19  ;;  %v1852_v28 = vld [vmem:[%s2558_s1 + $0x140] sm:$0xff] }
  0x2a   : > { %857 = vmatpush.bf16.msra.mxu2 %v1829_v18  ;;  %v331_v18 = vld [vmem:[%s2244_s20 + $0xb0] sm:$0xff]  ;;  %v321_v44 = vld [vmem:[%s2244_s20 + $0x60] sm:$0xff]  ;;  %v328_v49 = vld [vmem:[%s2244_s20 + $0x98] sm:$0xff] }
  0x2b   : > { %885 = vmatpush.bf16.msra.mxu3 %v1837_v33  ;;  %v366_v23 = vpack.c.bf16 %v331_v18, %v324_v17  ;;  %v341_v33 = vld [vmem:[%s2244_s20 + $0x100] sm:$0xff]  ;;  %v1868_v4 = vld [vmem:[%s2560_s3 + $0x38] sm:$0xff]  ;;  %v1866_v17 = vld [vmem:[%s2560_s3 + $0x28] sm:$0xff] }
  0x2c   : > { %v329_v45 = vld [vmem:[%s2244_s20 + $0xa0] sm:$0xff] }
  0x2d   : > { %1885 = vmatpush.bf16.msra.mxu1 %v1812_v20  ;;  %802 = vmatpush.bf16.msra.mxu0 %v1812_v20  ;;  %v327_v20 = vld [vmem:[%s2244_s20 + $0x90] sm:$0xff]  ;;  %v371_v48 = vpack.c.bf16 %v336_v46, %v329_v45  ;;  %v349_v56 = vld [vmem:[%s2244_s20 + $0x140] sm:$0xff] }
  0x2e   : > { %858 = vmatpush.bf16.msra.mxu2 %v1828_v22  ;;  %v1854_v22 = vld [vmem:[%s2558_s1 + $0x150] sm:$0xff]  ;;  %v369_v25 = vpack.c.bf16 %v334_v21, %v327_v20  ;;  %v357_v57 = vld [vmem:[%s2244_s20 + $0x180] sm:$0xff] }
  0x2f   : > { %886 = vmatpush.bf16.msra.mxu3 %v1836_v36 }
  0x30   : > { %813 = vmatmul.bf16.vlgmr.msra.gmra.mxu1 %v372_v30  ;;  %803 = vmatmul.bf16.vlgmr.msra.gmra.mxu0 %v358_v32  ;;  %v338_v30 = vld [vmem:[%s2244_s20 + $0xe8] sm:$0xff]  ;;  %v355_v32 = vld [vmem:[%s2244_s20 + $0x170] sm:$0xff] }
  0x31   : > { %823 = vmatpush.bf16.msrb.mxu1 %v1827_v26  ;;  %907 = vmatpush.bf16.msrb.mxu0 %v1851_v29  ;;  %v1853_v26 = vld [vmem:[%s2558_s1 + $0x148] sm:$0xff]  ;;  %v383_v36 = vpack.c.bf16 %v355_v32, %v355_v32 }
  0x32   : > { %1886 = vmatpush.bf16.msrb.mxu2 %v1851_v29  ;;  %887 = vmatmul.bf16.vlgmr.msra.gmra.mxu3 %v361_v41  ;;  %v382_v29 = vpack.c.bf16 %v354_v27, %v354_v27  ;;  %v380_v41 = vpack.c.bf16 %v352_v38, %v352_v38 }
  0x33   : > { %859 = vmatmul.bf16.vlgmr.msra.gmra.mxu2 %v360_v31  ;;  %v345_v31 = vld [vmem:[%s2244_s20 + $0x120] sm:$0xff]  ;;  %1070 = vmatpush.bf16.msrb.mxu3 %v1868_v4 }
  0x35   : > { %824 = vmatpush.bf16.msrb.mxu1 %v1826_v34  ;;  %908 = vmatpush.bf16.msrb.mxu0 %v1850_v35  ;;  %v348_v34 = vld [vmem:[%s2244_s20 + $0x138] sm:$0xff] }
  0x36   : > { %1887 = vmatpush.bf16.msrb.mxu2 %v1850_v35  ;;  %v373_v35 = vpack.c.bf16 %v345_v31, %v338_v30  ;;  %v376_v37 = vpack.c.bf16 %v348_v34, %v341_v33  ;;  %v1864_v34 = vld [vmem:[%s2560_s3 + $0x18] sm:$0xff] }
  0x39   : > { %825 = vmatpush.bf16.msrb.mxu1 %v1825_v39  ;;  %909 = vmatpush.bf16.msrb.mxu0 %v1849_v40  ;;  %v315_v39 = vld [vmem:[%s2244_s20 + $0x30] sm:$0xff] }
  0x3a   : > { %1888 = vmatpush.bf16.msrb.mxu2 %v1849_v40  ;;  %v322_v40 = vld [vmem:[%s2244_s20 + $0x68] sm:$0xff] }
  0x3d   : > { %826 = vmatpush.bf16.msrb.mxu1 %v1824_v42  ;;  %910 = vmatpush.bf16.msrb.mxu0 %v1848_v43  ;;  %v364_v42 = vpack.c.bf16 %v322_v40, %v315_v39 }
  0x3e   : > { %1889 = vmatpush.bf16.msrb.mxu2 %v1848_v43  ;;  %v314_v43 = vld [vmem:[%s2244_s20 + $0x28] sm:$0xff] }
  0x40   : > { %818 = vmatmul.bf16.gmra.mxu1 %v379_v51  ;;  %808 = vmatmul.bf16.gmra.mxu0 %v365_v53  ;;  %v343_v51 = vld [vmem:[%s2244_s20 + $0x110] sm:$0xff] }
  0x41   : > { %827 = vmatpush.bf16.msrb.mxu1 %v1823_v47  ;;  %911 = vmatpush.bf16.msrb.mxu0 %v1847_v50  ;;  %v363_v47 = vpack.c.bf16 %v321_v44, %v314_v43 }
  0x42   : > { %1890 = vmatpush.bf16.msrb.mxu2 %v1847_v50  ;;  %892 = vmatmul.bf16.gmra.mxu3 %v368_v60  ;;  %v335_v50 = vld [vmem:[%s2244_s20 + $0xd0] sm:$0xff] }
  0x43   : > { %864 = vmatmul.bf16.gmra.mxu2 %v367_v52  ;;  %v350_v52 = vld [vmem:[%s2244_s20 + $0x148] sm:$0xff]  ;;  %v370_v53 = vpack.c.bf16 %v335_v50, %v328_v49 }
  0x45   : > { %828 = vmatpush.bf16.msrb.mxu1 %v1822_v54  ;;  %912 = vmatpush.bf16.msrb.mxu0 %v1846_v55  ;;  %v378_v54 = vpack.c.bf16 %v350_v52, %v343_v51 }
  0x46   : > { %1891 = vmatpush.bf16.msrb.mxu2 %v1846_v55  ;;  %v342_v55 = vld [vmem:[%s2244_s20 + $0x108] sm:$0xff] }
  0x49   : > { %829 = vmatpush.bf16.msrb.mxu1 %v1821_v58  ;;  %913 = vmatpush.bf16.msrb.mxu0 %v1845_v59  ;;  %v377_v58 = vpack.c.bf16 %v349_v56, %v342_v55 }
  0x4a   : > { %1892 = vmatpush.bf16.msrb.mxu2 %v1845_v59  ;;  %v385_v59 = vpack.c.bf16 %v357_v57, %v357_v57 }
  0x4d   : > { %830 = vmatpush.bf16.msrb.mxu1 %v1820_v61  ;;  %914 = vmatpush.bf16.msrb.mxu0 %v1844_v63 }
  0x4e   : > { %1893 = vmatpush.bf16.msrb.mxu2 %v1844_v63  ;;  %v356_v63 = vld [vmem:[%s2244_s20 + $0x178] sm:$0xff] }
  0x4f   : > { %v384_v2 = vpack.c.bf16 %v356_v63, %v356_v63 }
  0x50   : > { %831 = vmatmul.bf16.vlgmr.msrb.gmra.mxu1 %v359_v7  ;;  %915 = vmatmul.bf16.vlgmr.msrb.gmra.mxu0 %v362_v9  ;;  %v1867_v9 = vld [vmem:[%s2560_s3 + $0x30] sm:$0xff] }
  0x51   : > { %935 = vmatpush.bf16.msra.mxu1 %v1859_v62  ;;  %1071 = vmatpush.bf16.msrb.mxu3 %v1867_v9 }
  0x52   : > { %970 = vmatpush.bf16.msra.mxu2 %v1860_v13  ;;  %897 = vmatmul.bf16.gmra.mxu3 %v375_v15 }
  0x53   : > { %869 = vmatmul.bf16.gmra.mxu2 %v374_v8 }
  0x55   : > { %936 = vmatpush.bf16.msra.mxu1 %v1858_v6  ;;  %1072 = vmatpush.bf16.msrb.mxu3 %v1866_v17 }
  0x59   : > { %937 = vmatpush.bf16.msra.mxu1 %v1857_v10  ;;  %v1985_v10 = vld [vmem:[%s2559_s2] ss:$0 sm:$0xff] }
  0x5d   : > { %938 = vmatpush.bf16.msra.mxu1 %v1856_v14 }
  0x60   : > { %836 = vmatmul.bf16.gmra.mxu1 %v366_v23  ;;  %920 = vmatmul.bf16.gmra.mxu0 %v369_v25  ;;  %v1865_v25 = vld [vmem:[%s2560_s3 + $0x20] sm:$0xff] }
  0x61   : > { %939 = vmatpush.bf16.msra.mxu1 %v1855_v16  ;;  %1073 = vmatpush.bf16.msrb.mxu3 %v1865_v25 }
  0x62   : > { %902 = vmatmul.bf16.gmra.mxu3 %v382_v29 }
  0x63   : > { %874 = vmatmul.bf16.gmra.mxu2 %v381_v24 }
  0x65   : > { %940 = vmatpush.bf16.msra.mxu1 %v1854_v22  ;;  %1074 = vmatpush.bf16.msrb.mxu3 %v1864_v34 }
  0x69   : > { %941 = vmatpush.bf16.msra.mxu1 %v1853_v26 }
  0x6d   : > { %942 = vmatpush.bf16.msra.mxu1 %v1852_v28 }
  0x70   : > { %841 = vmatmul.bf16.gmra.mxu1 %v373_v35  ;;  %925 = vmatmul.bf16.gmra.mxu0 %v376_v37 }
  0x73   : > { %930 = vmatmul.bf16.vlgmr.msrb.gmra.mxu2 %v383_v36 }
  0x80   : > { %846 = vmatmul.bf16.gmra.mxu1 %v380_v41 }
  0x83   : > { %1732 = vmatmul.msk.bf16.vlgmr.msra.gmra.mxu2 %vm782_vm0, %v364_v42  ;;  %v1863_v42 = vld [vmem:[%s2560_s3 + $0x10] sm:$0xff] }
  0x84   : > { %1075 = vmatpush.bf16.msrb.mxu3 %v1863_v42 }
  0x90   : > { %943 = vmatmul.bf16.vlgmr.msra.gmra.mxu1 %v363_v47 }
  0x93   : > { %1733 = vmatmul.msk.bf16.gmra.mxu2 %vm782_vm0, %v371_v48 }
  0xa0   : > { %948 = vmatmul.bf16.gmra.mxu1 %v370_v53  ;;  %v1862_v53 = vld [vmem:[%s2560_s3 + $0x8] sm:$0xff] }
  0xa1   : > { %1076 = vmatpush.bf16.msrb.mxu3 %v1862_v53 }
  0xa3   : > { %1734 = vmatmul.msk.bf16.gmra.mxu2 %vm782_vm0, %v378_v54 }
  0xad   : > { %v814_v60 = vpop.f32.mrf.mxu1  ;;  %v804_v5 = vpop.f32.mrf.mxu0 }
  0xae   : > { %v805_v11 = vadd.f32 %v1985_v10, %v804_v5  ;;  %v815_v48 = vadd.f32 %v1985_v10, %v814_v60  ;;  %v1861_v60 = vld [vmem:[%s2560_s3] sm:$0xff] }
  0xaf   : > { %1077 = vmatpush.bf16.msrb.mxu3 %v1861_v60  ;;  %v1871_v60 = vld [vmem:[%s2562_s5 + $0x10] sm:$0xff] }
  0xb0   : > { %953 = vmatmul.bf16.gmra.mxu1 %v377_v58 }
  0xb3   : > { %1735 = vmatmul.msk.bf16.gmra.mxu2 %vm782_vm0, %v385_v59 }
  0xb5   : > { %v2388_v62 = vpop.f32.mrf.mxu1  ;;  %v888_v1 = vpop.f32.mrf.mxu3 }
  0xb6   : > { %v860_v61 = vpop.f32.mrf.mxu2  ;;  %v806_v14 = vpop.f32.mrf.mxu0  ;;  %v817_v56 = vadd.f32 %v1985_v10, %v2388_v62 }
  0xb7   : > { %v807_v19 = vadd.f32 %v1985_v10, %v806_v14 }
  0xbd   : > { %v2391_v3 = vpop.f32.mrf.mxu1  ;;  %v890_v7 = vpop.f32.mrf.mxu3 }
  0xbe   : > { %v862_v0 = vpop.f32.mrf.mxu2  ;;  %v809_v26 = vpop.f32.mrf.mxu0 }
  0xbf   : > { %v810_v28 = vadd.f32 %v1985_v10, %v809_v26 }
  0xc0   : > { %958 = vmatmul.bf16.gmra.mxu1 %v384_v2 }
  0xc5   : > { %v821_v8 = vpop.f32.mrf.mxu1  ;;  %v893_v13 = vpop.f32.mrf.mxu3 }
  0xc6   : > { %v865_v6 = vpop.f32.mrf.mxu2  ;;  %v811_v36 = vpop.f32.mrf.mxu0 }
  0xc7   : > { %v812_v37 = vadd.f32 %v1985_v10, %v811_v36 }
  0xcd   : > { %v832_v15 = vpop.f32.mrf.mxu1  ;;  %v895_v22 = vpop.f32.mrf.mxu3 }
  0xce   : > { %v867_v12 = vpop.f32.mrf.mxu2  ;;  %v833_v16 = vadd.f32 %v832_v15, %v805_v11  ;;  %v916_v4 = vpop.f32.mrf.mxu0 }
  0xd0   : > { %v861_v18 = vadd.f32 %v860_v61, %v833_v16 }
  0xd2   : > { %v889_v20 = vadd.f32 %v888_v1, %v861_v18 }
  0xd5   : > { %v834_v23 = vpop.f32.mrf.mxu1  ;;  %v898_v31 = vpop.f32.mrf.mxu3 }
  0xd6   : > { %v870_v21 = vpop.f32.mrf.mxu2  ;;  %v835_v24 = vadd.f32 %v834_v23, %v807_v19  ;;  %v918_v9 = vpop.f32.mrf.mxu0 }
  0xd8   : > { %v863_v27 = vadd.f32 %v862_v0, %v835_v24  ;;  %v820_v0 = vadd.f32 %v1985_v10, %v2391_v3 }
  0xda   : > { %v891_v29 = vadd.f32 %v890_v7, %v863_v27 }
  0xdc   : > { %v919_v17 = vadd.f32 %v918_v9, %v891_v29 }
  0xdd   : > { %v837_v32 = vpop.f32.mrf.mxu1  ;;  %v900_v40 = vpop.f32.mrf.mxu3 }
  0xde   : > { %v872_v30 = vpop.f32.mrf.mxu2  ;;  %v838_v33 = vadd.f32 %v837_v32, %v810_v28  ;;  %v921_v15 = vpop.f32.mrf.mxu0 }
  0xe0   : > { %v866_v35 = vadd.f32 %v865_v6, %v838_v33 }
  0xe2   : > { %v894_v38 = vadd.f32 %v893_v13, %v866_v35  ;;  %v917_v13 = vadd.f32 %v916_v4, %v889_v20  ;;  %v1869_v4 = vld [vmem:[%s2562_s5] sm:$0xff] }
  0xe4   : > { %v922_v27 = vadd.f32 %v921_v15, %v894_v38  ;;  %v1875_v38 = vld [vmem:[%s2562_s5 + $0x30] sm:$0xff] }
  0xe5   : > { %v839_v41 = vpop.f32.mrf.mxu1  ;;  %v903_v47 = vpop.f32.mrf.mxu3 }
  0xe6   : > { %v875_v39 = vpop.f32.mrf.mxu2  ;;  %v840_v43 = vadd.f32 %v839_v41, %v812_v37  ;;  %v923_v25 = vpop.f32.mrf.mxu0  ;;  %v1876_v41 = vld [vmem:[%s2562_s5 + $0x38] sm:$0xff] }
  0xe7   : > { %1177 = vmatpush.bf16.msra.mxu0 %v1876_v41 }
  0xe8   : > { %v868_v44 = vadd.f32 %v867_v12, %v840_v43 }
  0xea   : > { %v896_v45 = vadd.f32 %v895_v22, %v868_v44 }
  0xeb   : > { %1178 = vmatpush.bf16.msra.mxu0 %v1875_v38 }
  0xed   : > { %v842_v49 = vpop.f32.mrf.mxu1  ;;  %v905_v55 = vpop.f32.mrf.mxu3 }
  0xee   : > { %v877_v46 = vpop.f32.mrf.mxu2  ;;  %v843_v50 = vadd.f32 %v842_v49, %v815_v48  ;;  %v926_v34 = vpop.f32.mrf.mxu0 }
  0xf0   : > { %v871_v51 = vadd.f32 %v870_v21, %v843_v50 }
  0xf2   : > { %v899_v52 = vadd.f32 %v898_v31, %v871_v51  ;;  %v924_v31 = vadd.f32 %v923_v25, %v896_v45 }
  0xf4   : > { %v927_v42 = vadd.f32 %v926_v34, %v899_v52  ;;  %v1873_v52 = vld [vmem:[%s2562_s5 + $0x20] sm:$0xff] }
  0xf5   : > { %v844_v57 = vpop.f32.mrf.mxu1 }
  0xf6   : > { %v931_v54 = vpop.f32.mrf.mxu2  ;;  %v845_v58 = vadd.f32 %v844_v57, %v817_v56  ;;  %v928_v43 = vpop.f32.mrf.mxu0  ;;  %v1872_v57 = vld [vmem:[%s2562_s5 + $0x18] sm:$0xff] }
  0xf8   : > { %v873_v59 = vadd.f32 %v872_v30, %v845_v58 }
  0xfa   : > { %v901_v61 = vadd.f32 %v900_v40, %v873_v59 }
  0xfc   : > { %v929_v46 = vadd.f32 %v928_v43, %v901_v61 }
  0xfd   : > { %v847_v1 = vpop.f32.mrf.mxu1 }
  0xfe   : > { %v933_v63 = vpop.f32.mrf.mxu2  ;;  %v848_v2 = vadd.f32 %v847_v1, %v820_v0 }
 0x100   : > { %v876_v5 = vadd.f32 %v875_v39, %v848_v2  ;;  %v1870_v2 = vld [vmem:[%s2562_s5 + $0x8] sm:$0xff] }
 0x102   : > { %v904_v6 = vadd.f32 %v903_v47, %v876_v5  ;;  %v1874_v47 = vld [vmem:[%s2562_s5 + $0x28] sm:$0xff] }
 0x103   : > { %1179 = vmatpush.bf16.msra.mxu0 %v1874_v47 }
 0x104   : > { %v932_v62 = vadd.f32 %v931_v54, %v904_v6  ;;  %v1986_v6 = vld [vmem:[%s2561_s4] ss:$0 sm:$0xff] }
 0x105   : > { %v849_v8 = vpop.f32.mrf.mxu1 }
 0x106   : > { %v972_v7 = vpop.f32.mrf.mxu2 }
 0x107   : > { %1180 = vmatpush.bf16.msra.mxu0 %v1873_v52 }
 0x10b   : > { %1181 = vmatpush.bf16.msra.mxu0 %v1872_v57 }
 0x10d   : > { %v944_v12 = vpop.f32.mrf.mxu1 }
 0x10e   : > { %v974_v11 = vpop.f32.mrf.mxu2  ;;  %v945_v14 = vadd.f32 %v944_v12, %v917_v13 }
 0x10f   : > { %1182 = vmatpush.bf16.msra.mxu0 %v1871_v60 }
 0x110   : > { %v973_v19 = vadd.f32 %v972_v7, %v945_v14 }
 0x112   : > { %v991_v10 = vmax.f32 %v973_v19, 0.0 }
 0x113   : > { %1183 = vmatpush.bf16.msra.mxu0 %v1870_v2 }
 0x115   : > { %v946_v18 = vpop.f32.mrf.mxu1 }
 0x116   : > { %v977_v16 = vpop.f32.mrf.mxu2  ;;  %v947_v21 = vadd.f32 %v946_v18, %v919_v17 }
 0x117   : > { %1184 = vmatpush.bf16.msra.mxu0 %v1869_v4 }
 0x118   : > { %v975_v3 = vadd.f32 %v974_v11, %v947_v21 }
 0x11a   : > { %v992_v22 = vmax.f32 %v975_v3, 0.0 }
 0x11c   : > { %v998_v24 = vpack.c.bf16 %v992_v22, %v991_v10 }
 0x11d   : > { %v949_v26 = vpop.f32.mrf.mxu1 }
 0x11e   : > { %v979_v23 = vpop.f32.mrf.mxu2  ;;  %1078 = vmatmul.bf16.vlgmr.msrb.gmra.mxu3 %v998_v24  ;;  %v950_v28 = vadd.f32 %v949_v26, %v922_v27 }
 0x120   : > { %v978_v32 = vadd.f32 %v977_v16, %v950_v28 }
 0x122   : > { %v993_v35 = vmax.f32 %v978_v32, 0.0 }
 0x125   : > { %v951_v20 = vpop.f32.mrf.mxu1 }
 0x126   : > { %v982_v30 = vpop.f32.mrf.mxu2  ;;  %v952_v33 = vadd.f32 %v951_v20, %v924_v31  ;;  %v1987_v20 = vld [vmem:[%s2563_s6] ss:$0 sm:$0xff] }
 0x128   : > { %v980_v29 = vadd.f32 %v979_v23, %v952_v33 }
 0x12a   : > { %v994_v36 = vmax.f32 %v980_v29, 0.0 }
 0x12c   : > { %v999_v39 = vpack.c.bf16 %v994_v36, %v993_v35 }
 0x12d   : > { %v954_v40 = vpop.f32.mrf.mxu1 }
 0x12e   : > { %v984_v37 = vpop.f32.mrf.mxu2  ;;  %1083 = vmatmul.bf16.gmra.mxu3 %v999_v39  ;;  %v955_v44 = vadd.f32 %v954_v40, %v927_v42 }
 0x130   : > { %v983_v49 = vadd.f32 %v982_v30, %v955_v44 }
 0x132   : > { %v995_v53 = vmax.f32 %v983_v49, 0.0 }
 0x135   : > { %v956_v48 = vpop.f32.mrf.mxu1 }
 0x136   : > { %v987_v45 = vpop.f32.mrf.mxu2  ;;  %v957_v50 = vadd.f32 %v956_v48, %v929_v46 }
 0x138   : > { %v985_v51 = vadd.f32 %v984_v37, %v957_v50 }
 0x13a   : > { %v996_v54 = vmax.f32 %v985_v51, 0.0 }
 0x13c   : > { %v1000_v56 = vpack.c.bf16 %v996_v54, %v995_v53 }
 0x13d   : > { %v959_v58 = vpop.f32.mrf.mxu1 }
 0x13e   : > { %v989_v55 = vpop.f32.mrf.mxu2  ;;  %1088 = vmatmul.bf16.gmra.mxu3 %v1000_v56  ;;  %v960_v59 = vadd.f32 %v959_v58, %v932_v62 }
 0x140   : > { %v988_v61 = vadd.f32 %v987_v45, %v960_v59 }
 0x142   : > { %v997_v0 = vmax.f32 %v988_v61, 0.0 }
 0x144   : > { %v1001_v1 = vpack.c.bf16 %v997_v0, %v997_v0 }
 0x145   : > { %v961_v63 = vpop.f32.mrf.mxu1 }
 0x14e   : > { %1093 = vmatmul.bf16.gmra.mxu3 %v1001_v1 }
 0x1a1   : > { %v1079_v5 = vpop.f32.mrf.mxu3 }
 0x1a2   : > { %v1080_v7 = vadd.f32 %v1986_v6, %v1079_v5 }
 0x1a4   : > { %v1098_v9 = vmax.f32 %v1080_v7, 0.0 }
 0x1a9   : > { %v1081_v62 = vpop.f32.mrf.mxu3 }
 0x1aa   : > { %v1082_v8 = vadd.f32 %v1986_v6, %v1081_v62 }
 0x1ac   : > { %v1099_v11 = vmax.f32 %v1082_v8, 0.0 }
 0x1ae   : > { %v1105_v12 = vpack.c.bf16 %v1099_v11, %v1098_v9 }
 0x1b0   : > { %1185 = vmatmul.bf16.vlgmr.msra.gmra.mxu0 %v1105_v12 }
 0x1b1   : > { %v1084_v13 = vpop.f32.mrf.mxu3 }
 0x1b2   : > { %v1085_v14 = vadd.f32 %v1986_v6, %v1084_v13 }
 0x1b4   : > { %v1100_v17 = vmax.f32 %v1085_v14, 0.0 }
 0x1b9   : > { %v1086_v15 = vpop.f32.mrf.mxu3 }
 0x1ba   : > { %v1087_v16 = vadd.f32 %v1986_v6, %v1086_v15 }
 0x1bc   : > { %v1101_v18 = vmax.f32 %v1087_v16, 0.0 }
 0x1be   : > { %v1106_v19 = vpack.c.bf16 %v1101_v18, %v1100_v17 }
 0x1c0   : > { %1190 = vmatmul.bf16.gmra.mxu0 %v1106_v19 }
 0x1c1   : > { %v1089_v21 = vpop.f32.mrf.mxu3 }
 0x1c2   : > { %v1090_v3 = vadd.f32 %v1986_v6, %v1089_v21 }
 0x1c4   : > { %v1102_v23 = vmax.f32 %v1090_v3, 0.0 }
 0x1c9   : > { %v1091_v10 = vpop.f32.mrf.mxu3 }
 0x1ca   : > { %v1092_v22 = vadd.f32 %v1986_v6, %v1091_v10 }
 0x1cc   : > { %v1103_v24 = vmax.f32 %v1092_v22, 0.0 }
 0x1ce   : > { %v1107_v25 = vpack.c.bf16 %v1103_v24, %v1102_v23 }
 0x1d0   : > { %1195 = vmatmul.bf16.gmra.mxu0 %v1107_v25 }
 0x1d1   : > { %v1094_v26 = vpop.f32.mrf.mxu3 }
 0x1d2   : > { %v1095_v27 = vadd.f32 %v1986_v6, %v1094_v26 }
 0x1d4   : > { %v1104_v30 = vmax.f32 %v1095_v27, 0.0 }
 0x1d6   : > { %v1108_v31 = vpack.c.bf16 %v1104_v30, %v1104_v30 }
 0x1d9   : > { %v1096_v28 = vpop.f32.mrf.mxu3 }
 0x1e0   : > { %1200 = vmatmul.bf16.gmra.mxu0 %v1108_v31 }
 0x22d   : > { %v1186_v32 = vpop.f32.mrf.mxu0 }
 0x22e   : > { %v2452_v33 = vadd.f32 %v1987_v20, %v1186_v32 }
 0x230   : > { %1205 = vmax.xlane.f32.xlu0 %v2452_v33 }
 0x235   : > { %v1188_v34 = vpop.f32.mrf.mxu0 }
 0x236   : > { %v2455_v29 = vadd.f32 %v1987_v20, %v1188_v34 }
 0x238   : > { %1207 = vmax.xlane.f32.xlu0 %v2455_v29 }
 0x23d   : > { %v1191_v35 = vpop.f32.mrf.mxu0 }
 0x23e   : > { %v2458_v36 = vadd.f32 %v1987_v20, %v1191_v35 }
 0x240   : > { %1209 = vmax.xlane.f32.xlu1 %v2458_v36 }
 0x245   : > { %v1193_v37 = vpop.f32.mrf.mxu0 }
 0x246   : > { %v2461_v39 = vadd.f32 %v1987_v20, %v1193_v37 }
 0x248   : > { %1211 = vmax.xlane.f32.xlu1 %v2461_v39 }
 0x24d   : > { %v1196_v40 = vpop.f32.mrf.mxu0 }
 0x24e   : > { %v2464_v41 = vadd.f32 %v1987_v20, %v1196_v40 }
 0x250   : > { %1213 = vmax.xlane.f32.xlu2 %v2464_v41 }
 0x255   : > { %v1198_v42 = vpop.f32.mrf.mxu0 }
 0x256   : > { %v2467_v38 = vadd.f32 %v1987_v20, %v1198_v42 }
 0x258   : > { %1215 = vmax.xlane.f32.xlu2 %v2467_v38 }
 0x25d   : > { %v1201_v43 = vpop.f32.mrf.mxu0 }
 0x25e   : > { %v2470_v44 = vadd.f32 %v1987_v20, %v1201_v43 }
 0x260   : > { %1217 = vmax.xlane.f32.xlu0 %v2470_v44 }
 0x265   : > { %v1203_v45 = vpop.f32.mrf.mxu0 }
 0x2a3   : > { %v1206_v46 = vpop.xlane.xlu0 %1205 }
 0x2a4   : > { %v1219_v47 = vsub.f32 %v2452_v33, %v1206_v46 }
 0x2a6   : > { %v1226_v48 = vmul.f32 1.442695, %v1219_v47 }
 0x2a8   : > { %1988 = vpow2.f32 %v1226_v48 }
 0x2ab   : > { %v1208_v49 = vpop.xlane.xlu0 %1207 }
 0x2ac   : > { %v1220_v50 = vsub.f32 %v2455_v29, %v1208_v49 }
 0x2ae   : > { %v1989_v51 = vpop.eup %1988  ;;  %v1228_v52 = vmul.f32 1.442695, %v1220_v50 }
 0x2af   : > { %1240 = vadd.xlane.f32.xlu1 %v1989_v51 }
 0x2b0   : > { %1990 = vpow2.f32 %v1228_v52 }
 0x2b3   : > { %v1210_v53 = vpop.xlane.xlu1 %1209 }
 0x2b4   : > { %v1221_v54 = vsub.f32 %v2458_v36, %v1210_v53 }
 0x2b6   : > { %v1991_v55 = vpop.eup %1990  ;;  %v1230_v56 = vmul.f32 1.442695, %v1221_v54 }
 0x2b7   : > { %1242 = vadd.xlane.f32.xlu2 %v1991_v55 }
 0x2b8   : > { %1992 = vpow2.f32 %v1230_v56 }
 0x2bb   : > { %v1212_v57 = vpop.xlane.xlu1 %1211 }
 0x2bc   : > { %v1222_v58 = vsub.f32 %v2461_v39, %v1212_v57 }
 0x2be   : > { %v1993_v59 = vpop.eup %1992  ;;  %v1232_v60 = vmul.f32 1.442695, %v1222_v58 }
 0x2bf   : > { %1244 = vadd.xlane.f32.xlu0 %v1993_v59 }
 0x2c0   : > { %1994 = vpow2.f32 %v1232_v60 }
 0x2c3   : > { %v1214_v61 = vpop.xlane.xlu2 %1213 }
 0x2c4   : > { %v1223_v63 = vsub.f32 %v2464_v41, %v1214_v61 }
 0x2c6   : > { %v1995_v0 = vpop.eup %1994  ;;  %v1234_v1 = vmul.f32 1.442695, %v1223_v63 }
 0x2c7   : > { %1246 = vadd.xlane.f32.xlu1 %v1995_v0 }
 0x2c8   : > { %1996 = vpow2.f32 %v1234_v1 }
 0x2cb   : > { %v1216_v2 = vpop.xlane.xlu2 %1215 }
 0x2cc   : > { %v1224_v4 = vsub.f32 %v2467_v38, %v1216_v2 }
 0x2ce   : > { %v1997_v5 = vpop.eup %1996  ;;  %v1236_v6 = vmul.f32 1.442695, %v1224_v4 }
 0x2cf   : > { %1248 = vadd.xlane.f32.xlu2 %v1997_v5 }
 0x2d0   : > { %1998 = vpow2.f32 %v1236_v6 }
 0x2d3   : > { %v1218_v7 = vpop.xlane.xlu0 %1217 }
 0x2d4   : > { %v1225_v62 = vsub.f32 %v2470_v44, %v1218_v7 }
 0x2d6   : > { %v1999_v8 = vpop.eup %1998  ;;  %v1238_v9 = vmul.f32 1.442695, %v1225_v62 }
 0x2d7   : > { %1250 = vadd.xlane.f32.xlu0 %v1999_v8 }
 0x2d8   : > { %2000 = vpow2.f32 %v1238_v9 }
 0x2de   : > { %v2001_v11 = vpop.eup %2000 }
 0x2df   : > { %1252 = vadd.xlane.f32.xlu1 %v2001_v11 }
 0x322   : > { %v1241_v12 = vpop.xlane.xlu1 %1240 }
 0x323   : > { %2002 = vlog2.f32 %v1241_v12 }
 0x329   : > { %v2003_v13 = vpop.eup %2002 }
 0x32a   : > { %v1255_v14 = vmul.f32 0.6931472, %v2003_v13  ;;  %v1243_v15 = vpop.xlane.xlu2 %1242 }
 0x32b   : > { %2004 = vlog2.f32 %v1243_v15 }
 0x32c   : > { %v1268_v16 = vadd.f32 %v1255_v14, %v1206_v46 }
 0x32e   : > { %v1275_v17 = vsub.f32 %v2452_v33, %v1268_v16 }
 0x330   : > { %1282 = vst [vmem:[%s2482_s12] sm:$0xff] %v1275_v17 }
 0x331   : > { %v2005_v18 = vpop.eup %2004 }
 0x332   : > { %v1257_v19 = vmul.f32 0.6931472, %v2005_v18  ;;  %v1245_v21 = vpop.xlane.xlu0 %1244 }
 0x333   : > { %2006 = vlog2.f32 %v1245_v21 }
 0x334   : > { %v1269_v3 = vadd.f32 %v1257_v19, %v1208_v49 }
 0x336   : > { %v1276_v10 = vsub.f32 %v2455_v29, %v1269_v3 }
 0x338   : > { %1283 = vst [vmem:[%s2482_s12 + $0x8] sm:$0xff] %v1276_v10 }
 0x339   : > { %v2007_v22 = vpop.eup %2006 }
 0x33a   : > { %v1259_v23 = vmul.f32 0.6931472, %v2007_v22  ;;  %v1247_v24 = vpop.xlane.xlu1 %1246 }
 0x33b   : > { %2008 = vlog2.f32 %v1247_v24 }
 0x33c   : > { %v1270_v25 = vadd.f32 %v1259_v23, %v1210_v53 }
 0x33e   : > { %v1277_v26 = vsub.f32 %v2458_v36, %v1270_v25 }
 0x340   : > { %1284 = vst [vmem:[%s2482_s12 + $0x10] sm:$0xff] %v1277_v26 }
 0x341   : > { %v2009_v27 = vpop.eup %2008 }
 0x342   : > { %v1261_v28 = vmul.f32 0.6931472, %v2009_v27  ;;  %v1249_v30 = vpop.xlane.xlu2 %1248 }
 0x343   : > { %2010 = vlog2.f32 %v1249_v30 }
 0x344   : > { %v1271_v31 = vadd.f32 %v1261_v28, %v1212_v57 }
 0x346   : > { %v1278_v20 = vsub.f32 %v2461_v39, %v1271_v31 }
 0x348   : > { %1285 = vst [vmem:[%s2482_s12 + $0x18] sm:$0xff] %v1278_v20 }
 0x349   : > { %v2011_v32 = vpop.eup %2010 }
 0x34a   : > { %v1263_v33 = vmul.f32 0.6931472, %v2011_v32  ;;  %v1251_v34 = vpop.xlane.xlu0 %1250 }
 0x34b   : > { %2012 = vlog2.f32 %v1251_v34 }
 0x34c   : > { %v1272_v29 = vadd.f32 %v1263_v33, %v1214_v61 }
 0x34e   : > { %v1279_v35 = vsub.f32 %v2464_v41, %v1272_v29 }
 0x350   : > { %1286 = vst [vmem:[%s2482_s12 + $0x20] sm:$0xff] %v1279_v35 }
 0x351   : > { %v2013_v36 = vpop.eup %2012 }
 0x352   : > { %v1265_v37 = vmul.f32 0.6931472, %v2013_v36  ;;  %v1253_v40 = vpop.xlane.xlu1 %1252 }
 0x353   : > { %2014 = vlog2.f32 %v1253_v40 }
 0x354   : > { %v1273_v42 = vadd.f32 %v1265_v37, %v1216_v2 }
 0x356   : > { %v1280_v43 = vsub.f32 %v2467_v38, %v1273_v42 }
 0x358   : > { %1287 = vst [vmem:[%s2482_s12 + $0x28] sm:$0xff] %v1280_v43 }
 0x359   : > { %v2015_v45 = vpop.eup %2014 }
 0x35a   : > { %v1267_v39 = vmul.f32 0.6931472, %v2015_v45 }
 0x35c   : > { %v1274_v46 = vadd.f32 %v1267_v39, %v1218_v7  ;;  %1295 = sbr.rel (!%p2175_p4) target bundleno = 919 (0x397), region = 52 }
 0x35e   : > { %v1281_v47 = vsub.f32 %v2470_v44, %v1274_v46 }
 0x360   : > { %1288 = vst [vmem:[%s2482_s12 + $0x30] sm:$0xff] %v1281_v47 }
 0x361   : > { %s2573_s24 = smov (!%p1298_p8, %s1297_s24), 7 }
 0x362   : > { %s1800_s17 = sshll.u32 %s2573_s24, 3 }
 0x363   : > { %p1803_p9 = scmp.eq.s32.totalorder %s1800_s17, 0 }
 0x364   : > { %2016 = sdivrem.u32 (!%p1803_p9), %s2573_s24, 7 }
 0x365   : > { %1306 = sbr.rel (%p1803_p9) target bundleno = 919 (0x397), region = 56 }
 0x36d   : > { %s2510_s9 = spop.drf %2016 }
 0x36e   : > { %s2018_s18 = spop.drf %2016  ;;  %p1804_p10 = scmp.le.s32.totalorder %s2510_s9, 0 }
 0x36f   : > { %s2566_s27 = smov (!%p1804_p10), %s2504_s16  ;;  %s2567_s26 = smov (!%p1804_p10), %s2482_s12 }
 0x370   : > { %1487 = sbr.rel (%p1804_p10) target bundleno = 893 (0x37d), region = 132  ;;  %s2519_s19 = smov (!%p1804_p10), 0  }
 0x371   : > { %s2521_s21 = smov (!%p1804_p10), 0  }
 0x375 LB: >> { %v1383_v41 = vld [vmem:[%s2084_s26] sm:$0xff]  ;;  %v1385_v38 = vld [vmem:[%s2084_s26 + $0x8] sm:$0xff]  ;;  %v1387_v44 = vld [vmem:[%s2084_s26 + $0x10] sm:$0xff]  ;;  %s1397_s22 = sadd.s32 1, %s2088_s19  ;;  %s1377_s21 = sadd.s32 1, %s2092_s21   ;;  %s2092_s21 = sphi %s2521_s21, %s1377_s21   ;;  %s2088_s19 = sphi %s2519_s19, %s2568_s19   ;;  %s2084_s26 = sphi %s2567_s26, %s1402_s26   ;;  %s2080_s27 = sphi %s2566_s27, %s1403_s27  }
 0x376   : >> { %1384 = vst [vmem:[%s2080_s27] sm:$0xff] %v1383_v41  ;;  %v1389_v48 = vld [vmem:[%s2084_s26 + $0x18] sm:$0xff]  ;;  %p1398_p11 = scmp.ge.s32.totalorder %s1397_s22, %s2510_s9  ;;  %v1391_v49 = vld [vmem:[%s2084_s26 + $0x20] sm:$0xff]  ;;  %v1393_v50 = vld [vmem:[%s2084_s26 + $0x28] sm:$0xff]  ;;  %p1376_p12 = scmp.ge.s32.totalorder %s1377_s21, %s2510_s9 }
 0x377   : >> { %1386 = vst [vmem:[%s2080_s27 + $0x8] sm:$0xff] %v1385_v38  ;;  %v1395_v51 = vld [vmem:[%s2084_s26 + $0x30] sm:$0xff] }
 0x378   : >> { %1388 = vst [vmem:[%s2080_s27 + $0x10] sm:$0xff] %v1387_v44  ;;  %s2575_s22 = smov (%p1398_p11, %s1397_s22), 0  ;;  %1379 = sbr.rel (!%p1376_p12) target bundleno = 885 (0x375), region = 138 }
 0x379   : >> { %1390 = vst [vmem:[%s2080_s27 + $0x18] sm:$0xff] %v1389_v48  ;;  %s1400_s23 = smul.u32 56, %s2575_s22  ;;  %s2568_s19 = smov %s2575_s22 }
 0x37a   : >> { %1392 = vst [vmem:[%s2080_s27 + $0x20] sm:$0xff] %v1391_v49 }
 0x37b   : >> { %1394 = vst [vmem:[%s2080_s27 + $0x28] sm:$0xff] %v1393_v50  ;;  %s1402_s26 = scalar_lea.vmem %s2482_s12, %s1400_s23 [#allocation2]  }
 0x37c   : >> { %1396 = vst [vmem:[%s2080_s27 + $0x30] sm:$0xff] %v1395_v51  ;;  %s1403_s27 = scalar_lea.vmem %s2504_s16, %s1400_s23  }
 0x37d PF: > { %2019 = sdivrem.u32 %s2573_s24, 7 }
 0x37e   : > { %s1805_s29 = smul.u32 56, %s2510_s9 }
 0x380   : > { %s2542_s20 = scalar_lea.vmem %s2482_s12, %s1805_s29 [#allocation2]   ;;  %s1410_s30 = scalar_lea.vmem %s2504_s16, %s1805_s29  }
 0x386   : > { %s2020_s10 = spop.drf %2019 }
 0x387   : > { %s2021_s11 = spop.drf %2019 }
 0x388   : > { %p1807_p13 = scmp.le.s32.totalorder %s2021_s11, 0 }
 0x389   : > { %s2094_s13 = smov (!%p1807_p13), %s1410_s30   ;;  %s2098_s14 = smov (!%p1807_p13), %s2542_s20  }
 0x38a   : > { %1501 = sbr.rel (%p1807_p13) target bundleno = 919 (0x397), region = 143  ;;  %s2102_s15 = smov (!%p1807_p13), 0  }
 0x38b   : > { %s2106_s17 = smov (!%p1807_p13), 0  }
 0x38f LB: >> { %v1420_v52 = vld [vmem:[%s2100_s14] sm:$0xff]  ;;  %s1422_s12 = sadd.s32 1, %s2104_s15  ;;  %s1414_s17 = sadd.s32 1, %s2108_s17   ;;  %s2108_s17 = sphi %s2106_s17, %s1414_s17   ;;  %s2104_s15 = sphi %s2102_s15, %s2103_s15   ;;  %s2100_s14 = sphi %s2098_s14, %s1427_s14   ;;  %s2096_s13 = sphi %s2094_s13, %s1428_s13  }
 0x390   : >> { %1421 = vst [vmem:[%s2096_s13] sm:$0xff] %v1420_v52  ;;  %p1423_p0 = scmp.ge.s32.totalorder %s1422_s12, %s2021_s11  ;;  %p1413_p1 = scmp.ge.s32.totalorder %s1414_s17, %s2021_s11 }
 0x392   : >> { %s2577_s12 = smov (%p1423_p0, %s1422_s12), 0  ;;  %1416 = sbr.rel (!%p1413_p1) target bundleno = 911 (0x38f), region = 149 }
 0x393   : >> { %s1808_s24 = sshll.u32 %s2577_s12, 3  ;;  %s2103_s15 = smov %s2577_s12  }
 0x394   : >> { %s1427_s14 = scalar_lea.vmem %s2542_s20, %s1808_s24 [#allocation2]   ;;  %s1428_s13 = scalar_lea.vmem %s1410_s30, %s1808_s24  }
 0x397 PF: > { %p14_p2 = scmp.ge.s32.totalorder %s2165_s28, 6   ;;  %s2569_s24 = smov %s2072_s25 }
 0x398   : > { %s2570_s25 = smov %s2173_s8  ;;  %s2571_s26 = smov %s2165_s28 }
 0x399   :  { %16 = sbr.rel (!%p14_p2) target bundleno = 2 (0x2), region = 160 }

</bundles_post_ra>
